<compile_context>
chip_gen: v7x
topology: tpu7x:2x2x1
jax: 0.10.0
libtpu: 0.0.40
codegen_flags: <defaults>
</compile_context>

<pallas_src>
import jax
import jax.numpy as jnp
from jax.experimental import pallas as pl
from jax.experimental.pallas import tpu as pltpu


# --------------------------------------------------------------------------
# Fused kernel: conv1+relu+pool1 -> conv2+relu+pool2, one image per grid step
# --------------------------------------------------------------------------
def _fused_cnn_kernel(p1_ref, w1_ref, b1_ref, w2_ref, b2_ref, o_ref, y1s_ref):
    # ---- layer 1: conv1 as one stacked im2col matmul over all 4 pool-1 phases
    # p1_ref[0]: (256, 9) bf16, rows = 64*phase + (32*p + 16*q + 4*i2 + j2)
    #            where pool-1 output position (i, j) = (2*i2 + p, 2*j2 + q)
    z1 = jnp.dot(p1_ref[0], w1_ref[...], preferred_element_type=jnp.float32)  # (256,16)
    m1 = jnp.maximum(jnp.maximum(z1[0:64], z1[64:128]),
                     jnp.maximum(z1[128:192], z1[192:256]))                   # pool-1
    y1 = jnp.maximum(m1 + b1_ref[...], 0.0)                                   # (64,16) f32

    # ---- stash parity blocks of y1 into a zero-padded VMEM scratch so every
    #      shifted layer-2 tap becomes a plain static pl.ds read (no strides).
    y1s_ref[...] = jnp.zeros_like(y1s_ref)
    for p in range(2):
        for q in range(2):
            y1s_ref[2 * p + q, 8:24, :] = y1[32 * p + 16 * q:32 * p + 16 * q + 16, :]

    # ---- 16 distinct shifted parity slabs (the in-VMEM layer-2 "im2col")
    rid = jax.lax.broadcasted_iota(jnp.int32, (16, 16), 0)
    jj = jnp.bitwise_and(rid, 3)                     # j2 of each flattened row
    taps = {}
    for u in (-1, 0, 1, 2):                          # u = a + dy - 1 (row offset)
        p = u % 2
        di = (u - p) // 2
        for v in (-1, 0, 1, 2):                      # v = b + dx - 1 (col offset)
            q = v % 2
            dj = (v - q) // 2
            s = y1s_ref[2 * p + q, pl.ds(8 + 4 * di + dj, 16), :]  # (16,16) f32
            if dj != 0:                              # mask rows whose j2+dj wraps
                keep = jnp.logical_and(jj + dj >= 0, jj + dj < 4)
                s = jnp.where(keep, s, 0.0)
            taps[(u, v)] = s.astype(jnp.bfloat16)

    # ---- layer 2: conv2 as 9 accumulated bf16 MXU dots with all 4 pool-2
    #      phases folded into M (64 rows), then pool-2 + bias + ReLU.
    acc = jnp.zeros((64, 16), jnp.float32)
    for dy in range(3):
        for dx in range(3):
            t = 3 * dy + dx
            lhs = jnp.concatenate(
                [taps[(a + dy - 1, b + dx - 1)] for a in (0, 1) for b in (0, 1)],
                axis=0)                                              # (64,16) bf16
            acc = acc + jnp.dot(lhs, w2_ref[16 * t:16 * t + 16, :],
                                preferred_element_type=jnp.float32)
    m2 = jnp.maximum(jnp.maximum(acc[0:16], acc[16:32]),
                     jnp.maximum(acc[32:48], acc[48:64]))            # pool-2 (16,16)
    o_ref[0] = jnp.maximum(m2 + b2_ref[...], 0.0)


# --------------------------------------------------------------------------
# Wrapper glue (XLA): layer-1 im2col only (Cin=1 -> 9 cols, negligible bytes)
# --------------------------------------------------------------------------
def _layer1_patches(x_nchw):
    """(N,1,16,16) -> (N,256,9) bf16; rows ordered [phase | p,q,i2,j2] so that
    the kernel's parity slicing of the layer-1 output is purely static."""
    n, _, h, w = x_nchw.shape
    x = x_nchw[:, 0]
    xp = jnp.pad(x, ((0, 0), (1, 1), (1, 1)))                  # SAME padding
    phases = []
    for a1 in range(2):
        for b1 in range(2):
            t9 = [xp[:, a1 + dy:a1 + dy + h:2, b1 + dx:b1 + dx + w:2]
                  for dy in range(3) for dx in range(3)]        # each (N,8,8)
            ph = jnp.stack(t9, axis=-1)                         # (N,8,8,9)
            ph = ph.reshape(n, 4, 2, 4, 2, 9)                   # (N,i2,p,j2,q,tap)
            ph = ph.transpose(0, 2, 4, 1, 3, 5)                 # (N,p,q,i2,j2,tap)
            phases.append(ph.reshape(n, 64, 9))
    return jnp.concatenate(phases, axis=1).astype(jnp.bfloat16)  # (N,256,9)


@jax.jit
def cnn_forward(x_nchw, params):
    n, c, h, w = x_nchw.shape
    assert c == 1 and h == 16 and w == 16, "kernel specialized to 1x16x16 inputs"
    patches = _layer1_patches(x_nchw)
    w1 = params["w1"].reshape(9, 16).astype(jnp.bfloat16)        # (dy,dx,cin)->row
    b1 = params["b1"].reshape(1, 16).astype(jnp.float32)
    w2 = params["w2"].reshape(144, 16).astype(jnp.bfloat16)
    b2 = params["b2"].reshape(1, 16).astype(jnp.float32)

    out = pl.pallas_call(
        _fused_cnn_kernel,
        out_shape=jax.ShapeDtypeStruct((n, 16, 16), jnp.float32),
        grid=(n,),
        in_specs=[pl.BlockSpec((1, 256, 9), lambda i: (i, 0, 0)),
                  pl.BlockSpec((9, 16), lambda i: (0, 0)),
                  pl.BlockSpec((1, 16), lambda i: (0, 0)),
                  pl.BlockSpec((144, 16), lambda i: (0, 0)),
                  pl.BlockSpec((1, 16), lambda i: (0, 0))],
        out_specs=pl.BlockSpec((1, 16, 16), lambda i: (i, 0, 0)),
        scratch_shapes=[pltpu.VMEM((4, 32, 16), jnp.float32)],
        compiler_params=pltpu.CompilerParams(
            dimension_semantics=("parallel",)),                  # megacore on v7x
    )(patches, w1, b1, w2, b2)

    # rows = 4*i2 + j2, cols = cout  ->  NCHW (N, 16, 4, 4)
    return out.reshape(n, 4, 4, 16).transpose(0, 3, 1, 2)


# --------------------------------------------------------------------------
# Params (mirror PyTorch shapes; weights stored HWIO) and pure-JAX reference
# --------------------------------------------------------------------------
def init_params(key):
    k1, k2, k3, k4 = jax.random.split(key, 4)
    lim1 = 1.0 / (1 * 9) ** 0.5
    lim2 = 1.0 / (16 * 9) ** 0.5
    return {
        "w1": jax.random.uniform(k1, (3, 3, 1, 16), jnp.float32, -lim1, lim1),
        "b1": jax.random.uniform(k2, (16,), jnp.float32, -lim1, lim1),
        "w2": jax.random.uniform(k3, (3, 3, 16, 16), jnp.float32, -lim2, lim2),
        "b2": jax.random.uniform(k4, (16,), jnp.float32, -lim2, lim2),
    }


def _ref_forward(x_nchw, params):
    def block(x, w_hwio, b):
        y = jax.lax.conv_general_dilated(
            x, w_hwio, window_strides=(1, 1), padding="SAME",
            dimension_numbers=("NHWC", "HWIO", "NHWC"),
            precision=jax.lax.Precision.HIGHEST)
        y = jnp.maximum(y + b, 0.0)
        return jax.lax.reduce_window(
            y, -jnp.inf, jax.lax.max, (1, 2, 2, 1), (1, 2, 2, 1), "VALID")

    x = jnp.transpose(x_nchw, (0, 2, 3, 1))
    y = block(x, params["w1"], params["b1"])
    y = block(y, params["w2"], params["b2"])
    return jnp.transpose(y, (0, 3, 1, 2))


if __name__ == "__main__":
    key = jax.random.PRNGKey(0)
    kx, kp = jax.random.split(key)
    x = jax.random.normal(kx, (2, 1, 16, 16), jnp.float32)       # NCHW, Cin=1
    params = init_params(kp)

    out = jax.block_until_ready(cnn_forward(x, params))
    assert out.shape == (2, 16, 4, 4), out.shape

    ref = jax.block_until_ready(_ref_forward(x, params))
    assert jnp.allclose(out, ref, atol=5e-2, rtol=5e-2), float(
        jnp.max(jnp.abs(out - ref)))

    print("KERNEL_OK")
</pallas_src>

<mosaic_0001>
module attributes {stable_mosaic.version = 11 : i64} {
  func.func @_fused_cnn_kernel(%arg0: i32, %arg1: memref<1x256x9xbf16, #tpu.memory_space<vmem>>, %arg2: memref<9x16xbf16, #tpu.memory_space<vmem>>, %arg3: memref<1x16xf32, #tpu.memory_space<vmem>>, %arg4: memref<144x16xbf16, #tpu.memory_space<vmem>>, %arg5: memref<1x16xf32, #tpu.memory_space<vmem>>, %arg6: memref<1x16x16xf32, #tpu.memory_space<vmem>>, %arg7: memref<4x32x16xf32, #tpu.memory_space<vmem>>) attributes {dimension_semantics = [#tpu.dimension_semantics<parallel>], iteration_bounds = array<i64: 2>, scalar_prefetch = 0 : i64, scratch_operands = 1 : i64, tpu.core_type = #tpu.core_type<tc>, window_params = [{transform_indices = @transform_0, window_bounds = array<i64: 1, 256, 9>}, {pipeline_mode = #tpu.pipeline_mode<synchronous>, transform_indices = @transform_1, window_bounds = array<i64: 9, 16>}, {pipeline_mode = #tpu.pipeline_mode<synchronous>, transform_indices = @transform_2, window_bounds = array<i64: 1, 16>}, {pipeline_mode = #tpu.pipeline_mode<synchronous>, transform_indices = @transform_3, window_bounds = array<i64: 144, 16>}, {pipeline_mode = #tpu.pipeline_mode<synchronous>, transform_indices = @transform_4, window_bounds = array<i64: 1, 16>}, {transform_indices = @transform_5, window_bounds = array<i64: 1, 16, 16>}]} {
    %c0 = arith.constant 0 : index
    %c0_0 = arith.constant 0 : index
    %c0_1 = arith.constant 0 : index
    %0 = vector.load %arg1[%c0, %c0_0, %c0_1] : memref<1x256x9xbf16, #tpu.memory_space<vmem>>, vector<1x256x9xbf16>
    %1 = vector.shape_cast %0 : vector<1x256x9xbf16> to vector<256x9xbf16>
    %c0_2 = arith.constant 0 : index
    %c0_3 = arith.constant 0 : index
    %2 = vector.load %arg2[%c0_2, %c0_3] : memref<9x16xbf16, #tpu.memory_space<vmem>>, vector<9x16xbf16>
    %cst = arith.constant dense<0.000000e+00> : vector<256x16xf32>
    %3 = tpu.matmul %1, %2, %cst {dimension_numbers = #tpu.dot_dimension_numbers<[1], [0], [0], [1], [0, 0, 1, 1], [], []>} : vector<256x9xbf16>, vector<9x16xbf16>, vector<256x16xf32> -> vector<256x16xf32>
    %4 = vector.extract_strided_slice %3 {offsets = [0, 0], sizes = [64, 16], strides = [1, 1]} : vector<256x16xf32> to vector<64x16xf32>
    %5 = vector.extract_strided_slice %3 {offsets = [64, 0], sizes = [64, 16], strides = [1, 1]} : vector<256x16xf32> to vector<64x16xf32>
    %6 = arith.maximumf %4, %5 : vector<64x16xf32>
    %7 = vector.extract_strided_slice %3 {offsets = [128, 0], sizes = [64, 16], strides = [1, 1]} : vector<256x16xf32> to vector<64x16xf32>
    %8 = vector.extract_strided_slice %3 {offsets = [192, 0], sizes = [64, 16], strides = [1, 1]} : vector<256x16xf32> to vector<64x16xf32>
    %9 = arith.maximumf %7, %8 : vector<64x16xf32>
    %10 = arith.maximumf %6, %9 : vector<64x16xf32>
    %c0_4 = arith.constant 0 : index
    %c0_5 = arith.constant 0 : index
    %11 = vector.load %arg3[%c0_4, %c0_5] : memref<1x16xf32, #tpu.memory_space<vmem>>, vector<1x16xf32>
    %12 = vector.broadcast %11 : vector<1x16xf32> to vector<64x16xf32>
    %13 = arith.addf %10, %12 : vector<64x16xf32>
    %cst_6 = arith.constant 0.000000e+00 : f32
    %14 = vector.broadcast %cst_6 : f32 to vector<64x16xf32>
    %15 = arith.maximumf %13, %14 : vector<64x16xf32>
    %cst_7 = arith.constant 0.000000e+00 : f32
    %16 = vector.broadcast %cst_7 : f32 to vector<4x32x16xf32>
    %c0_8 = arith.constant 0 : index
    %c0_9 = arith.constant 0 : index
    %c0_10 = arith.constant 0 : index
    %17 = vector.load %arg7[%c0_8, %c0_9, %c0_10] : memref<4x32x16xf32, #tpu.memory_space<vmem>>, vector<4x32x16xf32>
    tpu.vector_store %arg7[%c0_8, %c0_9, %c0_10], %16 {strides = array<i32>} : memref<4x32x16xf32, #tpu.memory_space<vmem>>, vector<4x32x16xf32>,
    %18 = vector.extract_strided_slice %15 {offsets = [0, 0], sizes = [16, 16], strides = [1, 1]} : vector<64x16xf32> to vector<16x16xf32>
    %c0_11 = arith.constant 0 : index
    %c8 = arith.constant 8 : index
    %c0_12 = arith.constant 0 : index
    %19 = vector.load %arg7[%c0_11, %c8, %c0_12] : memref<4x32x16xf32, #tpu.memory_space<vmem>>, vector<1x16x16xf32>
    %20 = vector.shape_cast %19 : vector<1x16x16xf32> to vector<16x16xf32>
    %21 = vector.shape_cast %18 : vector<16x16xf32> to vector<1x16x16xf32>
    tpu.vector_store %arg7[%c0_11, %c8, %c0_12], %21 {strides = array<i32>} : memref<4x32x16xf32, #tpu.memory_space<vmem>>, vector<1x16x16xf32>,
    %22 = vector.extract_strided_slice %15 {offsets = [16, 0], sizes = [16, 16], strides = [1, 1]} : vector<64x16xf32> to vector<16x16xf32>
    %c1 = arith.constant 1 : index
    %c8_13 = arith.constant 8 : index
    %c0_14 = arith.constant 0 : index
    %23 = vector.load %arg7[%c1, %c8_13, %c0_14] : memref<4x32x16xf32, #tpu.memory_space<vmem>>, vector<1x16x16xf32>
    %24 = vector.shape_cast %23 : vector<1x16x16xf32> to vector<16x16xf32>
    %25 = vector.shape_cast %22 : vector<16x16xf32> to vector<1x16x16xf32>
    tpu.vector_store %arg7[%c1, %c8_13, %c0_14], %25 {strides = array<i32>} : memref<4x32x16xf32, #tpu.memory_space<vmem>>, vector<1x16x16xf32>,
    %26 = vector.extract_strided_slice %15 {offsets = [32, 0], sizes = [16, 16], strides = [1, 1]} : vector<64x16xf32> to vector<16x16xf32>
    %c2 = arith.constant 2 : index
    %c8_15 = arith.constant 8 : index
    %c0_16 = arith.constant 0 : index
    %27 = vector.load %arg7[%c2, %c8_15, %c0_16] : memref<4x32x16xf32, #tpu.memory_space<vmem>>, vector<1x16x16xf32>
    %28 = vector.shape_cast %27 : vector<1x16x16xf32> to vector<16x16xf32>
    %29 = vector.shape_cast %26 : vector<16x16xf32> to vector<1x16x16xf32>
    tpu.vector_store %arg7[%c2, %c8_15, %c0_16], %29 {strides = array<i32>} : memref<4x32x16xf32, #tpu.memory_space<vmem>>, vector<1x16x16xf32>,
    %30 = vector.extract_strided_slice %15 {offsets = [48, 0], sizes = [16, 16], strides = [1, 1]} : vector<64x16xf32> to vector<16x16xf32>
    %c3 = arith.constant 3 : index
    %c8_17 = arith.constant 8 : index
    %c0_18 = arith.constant 0 : index
    %31 = vector.load %arg7[%c3, %c8_17, %c0_18] : memref<4x32x16xf32, #tpu.memory_space<vmem>>, vector<1x16x16xf32>
    %32 = vector.shape_cast %31 : vector<1x16x16xf32> to vector<16x16xf32>
    %33 = vector.shape_cast %30 : vector<16x16xf32> to vector<1x16x16xf32>
    tpu.vector_store %arg7[%c3, %c8_17, %c0_18], %33 {strides = array<i32>} : memref<4x32x16xf32, #tpu.memory_space<vmem>>, vector<1x16x16xf32>,
    %34 = tpu.iota {dimensions = array<i32: 0>} : vector<16x16xi32>
    %c3_i32 = arith.constant 3 : i32
    %35 = vector.broadcast %c3_i32 : i32 to vector<16x16xi32>
    %36 = arith.andi %34, %35 : vector<16x16xi32>
    %c3_19 = arith.constant 3 : index
    %c3_20 = arith.constant 3 : index
    %c0_21 = arith.constant 0 : index
    %37 = vector.load %arg7[%c3_19, %c3_20, %c0_21] : memref<4x32x16xf32, #tpu.memory_space<vmem>>, vector<1x16x16xf32>
    %38 = vector.shape_cast %37 : vector<1x16x16xf32> to vector<16x16xf32>
    %c-1_i32 = arith.constant -1 : i32
    %39 = vector.broadcast %c-1_i32 : i32 to vector<16x16xi32>
    %40 = arith.addi %36, %39 : vector<16x16xi32>
    %c0_i32 = arith.constant 0 : i32
    %41 = vector.broadcast %c0_i32 : i32 to vector<16x16xi32>
    %42 = arith.cmpi sge, %40, %41 : vector<16x16xi32>
    %c-1_i32_22 = arith.constant -1 : i32
    %43 = vector.broadcast %c-1_i32_22 : i32 to vector<16x16xi32>
    %44 = arith.addi %36, %43 : vector<16x16xi32>
    %c4_i32 = arith.constant 4 : i32
    %45 = vector.broadcast %c4_i32 : i32 to vector<16x16xi32>
    %46 = arith.cmpi slt, %44, %45 : vector<16x16xi32>
    %47 = arith.andi %42, %46 : vector<16x16xi1>
    %cst_23 = arith.constant 0.000000e+00 : f32
    %48 = vector.broadcast %cst_23 : f32 to vector<16x16xf32>
    %49 = arith.select %47, %38, %48 : vector<16x16xi1>, vector<16x16xf32>
    %50 = arith.truncf %49 : vector<16x16xf32> to vector<16x16xbf16>
    %c2_24 = arith.constant 2 : index
    %c4 = arith.constant 4 : index
    %c0_25 = arith.constant 0 : index
    %51 = vector.load %arg7[%c2_24, %c4, %c0_25] : memref<4x32x16xf32, #tpu.memory_space<vmem>>, vector<1x16x16xf32>
    %52 = vector.shape_cast %51 : vector<1x16x16xf32> to vector<16x16xf32>
    %53 = arith.truncf %52 : vector<16x16xf32> to vector<16x16xbf16>
    %c3_26 = arith.constant 3 : index
    %c4_27 = arith.constant 4 : index
    %c0_28 = arith.constant 0 : index
    %54 = vector.load %arg7[%c3_26, %c4_27, %c0_28] : memref<4x32x16xf32, #tpu.memory_space<vmem>>, vector<1x16x16xf32>
    %55 = vector.shape_cast %54 : vector<1x16x16xf32> to vector<16x16xf32>
    %56 = arith.truncf %55 : vector<16x16xf32> to vector<16x16xbf16>
    %c2_29 = arith.constant 2 : index
    %c5 = arith.constant 5 : index
    %c0_30 = arith.constant 0 : index
    %57 = vector.load %arg7[%c2_29, %c5, %c0_30] : memref<4x32x16xf32, #tpu.memory_space<vmem>>, vector<1x16x16xf32>
    %58 = vector.shape_cast %57 : vector<1x16x16xf32> to vector<16x16xf32>
    %c1_i32 = arith.constant 1 : i32
    %59 = vector.broadcast %c1_i32 : i32 to vector<16x16xi32>
    %60 = arith.addi %36, %59 : vector<16x16xi32>
    %c0_i32_31 = arith.constant 0 : i32
    %61 = vector.broadcast %c0_i32_31 : i32 to vector<16x16xi32>
    %62 = arith.cmpi sge, %60, %61 : vector<16x16xi32>
    %c1_i32_32 = arith.constant 1 : i32
    %63 = vector.broadcast %c1_i32_32 : i32 to vector<16x16xi32>
    %64 = arith.addi %36, %63 : vector<16x16xi32>
    %c4_i32_33 = arith.constant 4 : i32
    %65 = vector.broadcast %c4_i32_33 : i32 to vector<16x16xi32>
    %66 = arith.cmpi slt, %64, %65 : vector<16x16xi32>
    %67 = arith.andi %62, %66 : vector<16x16xi1>
    %cst_34 = arith.constant 0.000000e+00 : f32
    %68 = vector.broadcast %cst_34 : f32 to vector<16x16xf32>
    %69 = arith.select %67, %58, %68 : vector<16x16xi1>, vector<16x16xf32>
    %70 = arith.truncf %69 : vector<16x16xf32> to vector<16x16xbf16>
    %c1_35 = arith.constant 1 : index
    %c7 = arith.constant 7 : index
    %c0_36 = arith.constant 0 : index
    %71 = vector.load %arg7[%c1_35, %c7, %c0_36] : memref<4x32x16xf32, #tpu.memory_space<vmem>>, vector<1x16x16xf32>
    %72 = vector.shape_cast %71 : vector<1x16x16xf32> to vector<16x16xf32>
    %c-1_i32_37 = arith.constant -1 : i32
    %73 = vector.broadcast %c-1_i32_37 : i32 to vector<16x16xi32>
    %74 = arith.addi %36, %73 : vector<16x16xi32>
    %c0_i32_38 = arith.constant 0 : i32
    %75 = vector.broadcast %c0_i32_38 : i32 to vector<16x16xi32>
    %76 = arith.cmpi sge, %74, %75 : vector<16x16xi32>
    %c-1_i32_39 = arith.constant -1 : i32
    %77 = vector.broadcast %c-1_i32_39 : i32 to vector<16x16xi32>
    %78 = arith.addi %36, %77 : vector<16x16xi32>
    %c4_i32_40 = arith.constant 4 : i32
    %79 = vector.broadcast %c4_i32_40 : i32 to vector<16x16xi32>
    %80 = arith.cmpi slt, %78, %79 : vector<16x16xi32>
    %81 = arith.andi %76, %80 : vector<16x16xi1>
    %cst_41 = arith.constant 0.000000e+00 : f32
    %82 = vector.broadcast %cst_41 : f32 to vector<16x16xf32>
    %83 = arith.select %81, %72, %82 : vector<16x16xi1>, vector<16x16xf32>
    %84 = arith.truncf %83 : vector<16x16xf32> to vector<16x16xbf16>
    %c0_42 = arith.constant 0 : index
    %c8_43 = arith.constant 8 : index
    %c0_44 = arith.constant 0 : index
    %85 = vector.load %arg7[%c0_42, %c8_43, %c0_44] : memref<4x32x16xf32, #tpu.memory_space<vmem>>, vector<1x16x16xf32>
    %86 = vector.shape_cast %85 : vector<1x16x16xf32> to vector<16x16xf32>
    %87 = arith.truncf %86 : vector<16x16xf32> to vector<16x16xbf16>
    %c1_45 = arith.constant 1 : index
    %c8_46 = arith.constant 8 : index
    %c0_47 = arith.constant 0 : index
    %88 = vector.load %arg7[%c1_45, %c8_46, %c0_47] : memref<4x32x16xf32, #tpu.memory_space<vmem>>, vector<1x16x16xf32>
    %89 = vector.shape_cast %88 : vector<1x16x16xf32> to vector<16x16xf32>
    %90 = arith.truncf %89 : vector<16x16xf32> to vector<16x16xbf16>
    %c0_48 = arith.constant 0 : index
    %c9 = arith.constant 9 : index
    %c0_49 = arith.constant 0 : index
    %91 = vector.load %arg7[%c0_48, %c9, %c0_49] : memref<4x32x16xf32, #tpu.memory_space<vmem>>, vector<1x16x16xf32>
    %92 = vector.shape_cast %91 : vector<1x16x16xf32> to vector<16x16xf32>
    %c1_i32_50 = arith.constant 1 : i32
    %93 = vector.broadcast %c1_i32_50 : i32 to vector<16x16xi32>
    %94 = arith.addi %36, %93 : vector<16x16xi32>
    %c0_i32_51 = arith.constant 0 : i32
    %95 = vector.broadcast %c0_i32_51 : i32 to vector<16x16xi32>
    %96 = arith.cmpi sge, %94, %95 : vector<16x16xi32>
    %c1_i32_52 = arith.constant 1 : i32
    %97 = vector.broadcast %c1_i32_52 : i32 to vector<16x16xi32>
    %98 = arith.addi %36, %97 : vector<16x16xi32>
    %c4_i32_53 = arith.constant 4 : i32
    %99 = vector.broadcast %c4_i32_53 : i32 to vector<16x16xi32>
    %100 = arith.cmpi slt, %98, %99 : vector<16x16xi32>
    %101 = arith.andi %96, %100 : vector<16x16xi1>
    %cst_54 = arith.constant 0.000000e+00 : f32
    %102 = vector.broadcast %cst_54 : f32 to vector<16x16xf32>
    %103 = arith.select %101, %92, %102 : vector<16x16xi1>, vector<16x16xf32>
    %104 = arith.truncf %103 : vector<16x16xf32> to vector<16x16xbf16>
    %c3_55 = arith.constant 3 : index
    %c7_56 = arith.constant 7 : index
    %c0_57 = arith.constant 0 : index
    %105 = vector.load %arg7[%c3_55, %c7_56, %c0_57] : memref<4x32x16xf32, #tpu.memory_space<vmem>>, vector<1x16x16xf32>
    %106 = vector.shape_cast %105 : vector<1x16x16xf32> to vector<16x16xf32>
    %c-1_i32_58 = arith.constant -1 : i32
    %107 = vector.broadcast %c-1_i32_58 : i32 to vector<16x16xi32>
    %108 = arith.addi %36, %107 : vector<16x16xi32>
    %c0_i32_59 = arith.constant 0 : i32
    %109 = vector.broadcast %c0_i32_59 : i32 to vector<16x16xi32>
    %110 = arith.cmpi sge, %108, %109 : vector<16x16xi32>
    %c-1_i32_60 = arith.constant -1 : i32
    %111 = vector.broadcast %c-1_i32_60 : i32 to vector<16x16xi32>
    %112 = arith.addi %36, %111 : vector<16x16xi32>
    %c4_i32_61 = arith.constant 4 : i32
    %113 = vector.broadcast %c4_i32_61 : i32 to vector<16x16xi32>
    %114 = arith.cmpi slt, %112, %113 : vector<16x16xi32>
    %115 = arith.andi %110, %114 : vector<16x16xi1>
    %cst_62 = arith.constant 0.000000e+00 : f32
    %116 = vector.broadcast %cst_62 : f32 to vector<16x16xf32>
    %117 = arith.select %115, %106, %116 : vector<16x16xi1>, vector<16x16xf32>
    %118 = arith.truncf %117 : vector<16x16xf32> to vector<16x16xbf16>
    %c2_63 = arith.constant 2 : index
    %c8_64 = arith.constant 8 : index
    %c0_65 = arith.constant 0 : index
    %119 = vector.load %arg7[%c2_63, %c8_64, %c0_65] : memref<4x32x16xf32, #tpu.memory_space<vmem>>, vector<1x16x16xf32>
    %120 = vector.shape_cast %119 : vector<1x16x16xf32> to vector<16x16xf32>
    %121 = arith.truncf %120 : vector<16x16xf32> to vector<16x16xbf16>
    %c3_66 = arith.constant 3 : index
    %c8_67 = arith.constant 8 : index
    %c0_68 = arith.constant 0 : index
    %122 = vector.load %arg7[%c3_66, %c8_67, %c0_68] : memref<4x32x16xf32, #tpu.memory_space<vmem>>, vector<1x16x16xf32>
    %123 = vector.shape_cast %122 : vector<1x16x16xf32> to vector<16x16xf32>
    %124 = arith.truncf %123 : vector<16x16xf32> to vector<16x16xbf16>
    %c2_69 = arith.constant 2 : index
    %c9_70 = arith.constant 9 : index
    %c0_71 = arith.constant 0 : index
    %125 = vector.load %arg7[%c2_69, %c9_70, %c0_71] : memref<4x32x16xf32, #tpu.memory_space<vmem>>, vector<1x16x16xf32>
    %126 = vector.shape_cast %125 : vector<1x16x16xf32> to vector<16x16xf32>
    %c1_i32_72 = arith.constant 1 : i32
    %127 = vector.broadcast %c1_i32_72 : i32 to vector<16x16xi32>
    %128 = arith.addi %36, %127 : vector<16x16xi32>
    %c0_i32_73 = arith.constant 0 : i32
    %129 = vector.broadcast %c0_i32_73 : i32 to vector<16x16xi32>
    %130 = arith.cmpi sge, %128, %129 : vector<16x16xi32>
    %c1_i32_74 = arith.constant 1 : i32
    %131 = vector.broadcast %c1_i32_74 : i32 to vector<16x16xi32>
    %132 = arith.addi %36, %131 : vector<16x16xi32>
    %c4_i32_75 = arith.constant 4 : i32
    %133 = vector.broadcast %c4_i32_75 : i32 to vector<16x16xi32>
    %134 = arith.cmpi slt, %132, %133 : vector<16x16xi32>
    %135 = arith.andi %130, %134 : vector<16x16xi1>
    %cst_76 = arith.constant 0.000000e+00 : f32
    %136 = vector.broadcast %cst_76 : f32 to vector<16x16xf32>
    %137 = arith.select %135, %126, %136 : vector<16x16xi1>, vector<16x16xf32>
    %138 = arith.truncf %137 : vector<16x16xf32> to vector<16x16xbf16>
    %c1_77 = arith.constant 1 : index
    %c11 = arith.constant 11 : index
    %c0_78 = arith.constant 0 : index
    %139 = vector.load %arg7[%c1_77, %c11, %c0_78] : memref<4x32x16xf32, #tpu.memory_space<vmem>>, vector<1x16x16xf32>
    %140 = vector.shape_cast %139 : vector<1x16x16xf32> to vector<16x16xf32>
    %c-1_i32_79 = arith.constant -1 : i32
    %141 = vector.broadcast %c-1_i32_79 : i32 to vector<16x16xi32>
    %142 = arith.addi %36, %141 : vector<16x16xi32>
    %c0_i32_80 = arith.constant 0 : i32
    %143 = vector.broadcast %c0_i32_80 : i32 to vector<16x16xi32>
    %144 = arith.cmpi sge, %142, %143 : vector<16x16xi32>
    %c-1_i32_81 = arith.constant -1 : i32
    %145 = vector.broadcast %c-1_i32_81 : i32 to vector<16x16xi32>
    %146 = arith.addi %36, %145 : vector<16x16xi32>
    %c4_i32_82 = arith.constant 4 : i32
    %147 = vector.broadcast %c4_i32_82 : i32 to vector<16x16xi32>
    %148 = arith.cmpi slt, %146, %147 : vector<16x16xi32>
    %149 = arith.andi %144, %148 : vector<16x16xi1>
    %cst_83 = arith.constant 0.000000e+00 : f32
    %150 = vector.broadcast %cst_83 : f32 to vector<16x16xf32>
    %151 = arith.select %149, %140, %150 : vector<16x16xi1>, vector<16x16xf32>
    %152 = arith.truncf %151 : vector<16x16xf32> to vector<16x16xbf16>
    %c0_84 = arith.constant 0 : index
    %c12 = arith.constant 12 : index
    %c0_85 = arith.constant 0 : index
    %153 = vector.load %arg7[%c0_84, %c12, %c0_85] : memref<4x32x16xf32, #tpu.memory_space<vmem>>, vector<1x16x16xf32>
    %154 = vector.shape_cast %153 : vector<1x16x16xf32> to vector<16x16xf32>
    %155 = arith.truncf %154 : vector<16x16xf32> to vector<16x16xbf16>
    %c1_86 = arith.constant 1 : index
    %c12_87 = arith.constant 12 : index
    %c0_88 = arith.constant 0 : index
    %156 = vector.load %arg7[%c1_86, %c12_87, %c0_88] : memref<4x32x16xf32, #tpu.memory_space<vmem>>, vector<1x16x16xf32>
    %157 = vector.shape_cast %156 : vector<1x16x16xf32> to vector<16x16xf32>
    %158 = arith.truncf %157 : vector<16x16xf32> to vector<16x16xbf16>
    %c0_89 = arith.constant 0 : index
    %c13 = arith.constant 13 : index
    %c0_90 = arith.constant 0 : index
    %159 = vector.load %arg7[%c0_89, %c13, %c0_90] : memref<4x32x16xf32, #tpu.memory_space<vmem>>, vector<1x16x16xf32>
    %160 = vector.shape_cast %159 : vector<1x16x16xf32> to vector<16x16xf32>
    %c1_i32_91 = arith.constant 1 : i32
    %161 = vector.broadcast %c1_i32_91 : i32 to vector<16x16xi32>
    %162 = arith.addi %36, %161 : vector<16x16xi32>
    %c0_i32_92 = arith.constant 0 : i32
    %163 = vector.broadcast %c0_i32_92 : i32 to vector<16x16xi32>
    %164 = arith.cmpi sge, %162, %163 : vector<16x16xi32>
    %c1_i32_93 = arith.constant 1 : i32
    %165 = vector.broadcast %c1_i32_93 : i32 to vector<16x16xi32>
    %166 = arith.addi %36, %165 : vector<16x16xi32>
    %c4_i32_94 = arith.constant 4 : i32
    %167 = vector.broadcast %c4_i32_94 : i32 to vector<16x16xi32>
    %168 = arith.cmpi slt, %166, %167 : vector<16x16xi32>
    %169 = arith.andi %164, %168 : vector<16x16xi1>
    %cst_95 = arith.constant 0.000000e+00 : f32
    %170 = vector.broadcast %cst_95 : f32 to vector<16x16xf32>
    %171 = arith.select %169, %160, %170 : vector<16x16xi1>, vector<16x16xf32>
    %172 = arith.truncf %171 : vector<16x16xf32> to vector<16x16xbf16>
    %cst_96 = arith.constant 0.000000e+00 : f32
    %173 = vector.broadcast %cst_96 : f32 to vector<64x16xf32>
    %174 = tpu.concatenate %50, %53, %84, %87 in 0 : vector<16x16xbf16>, vector<16x16xbf16>, vector<16x16xbf16>, vector<16x16xbf16> -> vector<64x16xbf16>
    %c0_97 = arith.constant 0 : index
    %c0_98 = arith.constant 0 : index
    %175 = vector.load %arg4[%c0_97, %c0_98] : memref<144x16xbf16, #tpu.memory_space<vmem>>, vector<16x16xbf16>
    %cst_99 = arith.constant dense<0.000000e+00> : vector<64x16xf32>
    %176 = tpu.matmul %174, %175, %cst_99 {dimension_numbers = #tpu.dot_dimension_numbers<[1], [0], [0], [1], [0, 0, 1, 1], [], []>} : vector<64x16xbf16>, vector<16x16xbf16>, vector<64x16xf32> -> vector<64x16xf32>
    %177 = arith.addf %173, %176 : vector<64x16xf32>
    %178 = tpu.concatenate %53, %56, %87, %90 in 0 : vector<16x16xbf16>, vector<16x16xbf16>, vector<16x16xbf16>, vector<16x16xbf16> -> vector<64x16xbf16>
    %c16 = arith.constant 16 : index
    %c0_100 = arith.constant 0 : index
    %179 = vector.load %arg4[%c16, %c0_100] : memref<144x16xbf16, #tpu.memory_space<vmem>>, vector<16x16xbf16>
    %cst_101 = arith.constant dense<0.000000e+00> : vector<64x16xf32>
    %180 = tpu.matmul %178, %179, %cst_101 {dimension_numbers = #tpu.dot_dimension_numbers<[1], [0], [0], [1], [0, 0, 1, 1], [], []>} : vector<64x16xbf16>, vector<16x16xbf16>, vector<64x16xf32> -> vector<64x16xf32>
    %181 = arith.addf %177, %180 : vector<64x16xf32>
    %182 = tpu.concatenate %56, %70, %90, %104 in 0 : vector<16x16xbf16>, vector<16x16xbf16>, vector<16x16xbf16>, vector<16x16xbf16> -> vector<64x16xbf16>
    %c32 = arith.constant 32 : index
    %c0_102 = arith.constant 0 : index
    %183 = vector.load %arg4[%c32, %c0_102] : memref<144x16xbf16, #tpu.memory_space<vmem>>, vector<16x16xbf16>
    %cst_103 = arith.constant dense<0.000000e+00> : vector<64x16xf32>
    %184 = tpu.matmul %182, %183, %cst_103 {dimension_numbers = #tpu.dot_dimension_numbers<[1], [0], [0], [1], [0, 0, 1, 1], [], []>} : vector<64x16xbf16>, vector<16x16xbf16>, vector<64x16xf32> -> vector<64x16xf32>
    %185 = arith.addf %181, %184 : vector<64x16xf32>
    %186 = tpu.concatenate %84, %87, %118, %121 in 0 : vector<16x16xbf16>, vector<16x16xbf16>, vector<16x16xbf16>, vector<16x16xbf16> -> vector<64x16xbf16>
    %c48 = arith.constant 48 : index
    %c0_104 = arith.constant 0 : index
    %187 = vector.load %arg4[%c48, %c0_104] : memref<144x16xbf16, #tpu.memory_space<vmem>>, vector<16x16xbf16>
    %cst_105 = arith.constant dense<0.000000e+00> : vector<64x16xf32>
    %188 = tpu.matmul %186, %187, %cst_105 {dimension_numbers = #tpu.dot_dimension_numbers<[1], [0], [0], [1], [0, 0, 1, 1], [], []>} : vector<64x16xbf16>, vector<16x16xbf16>, vector<64x16xf32> -> vector<64x16xf32>
    %189 = arith.addf %185, %188 : vector<64x16xf32>
    %190 = tpu.concatenate %87, %90, %121, %124 in 0 : vector<16x16xbf16>, vector<16x16xbf16>, vector<16x16xbf16>, vector<16x16xbf16> -> vector<64x16xbf16>
    %c64 = arith.constant 64 : index
    %c0_106 = arith.constant 0 : index
    %191 = vector.load %arg4[%c64, %c0_106] : memref<144x16xbf16, #tpu.memory_space<vmem>>, vector<16x16xbf16>
    %cst_107 = arith.constant dense<0.000000e+00> : vector<64x16xf32>
    %192 = tpu.matmul %190, %191, %cst_107 {dimension_numbers = #tpu.dot_dimension_numbers<[1], [0], [0], [1], [0, 0, 1, 1], [], []>} : vector<64x16xbf16>, vector<16x16xbf16>, vector<64x16xf32> -> vector<64x16xf32>
    %193 = arith.addf %189, %192 : vector<64x16xf32>
    %194 = tpu.concatenate %90, %104, %124, %138 in 0 : vector<16x16xbf16>, vector<16x16xbf16>, vector<16x16xbf16>, vector<16x16xbf16> -> vector<64x16xbf16>
    %c80 = arith.constant 80 : index
    %c0_108 = arith.constant 0 : index
    %195 = vector.load %arg4[%c80, %c0_108] : memref<144x16xbf16, #tpu.memory_space<vmem>>, vector<16x16xbf16>
    %cst_109 = arith.constant dense<0.000000e+00> : vector<64x16xf32>
    %196 = tpu.matmul %194, %195, %cst_109 {dimension_numbers = #tpu.dot_dimension_numbers<[1], [0], [0], [1], [0, 0, 1, 1], [], []>} : vector<64x16xbf16>, vector<16x16xbf16>, vector<64x16xf32> -> vector<64x16xf32>
    %197 = arith.addf %193, %196 : vector<64x16xf32>
    %198 = tpu.concatenate %118, %121, %152, %155 in 0 : vector<16x16xbf16>, vector<16x16xbf16>, vector<16x16xbf16>, vector<16x16xbf16> -> vector<64x16xbf16>
    %c96 = arith.constant 96 : index
    %c0_110 = arith.constant 0 : index
    %199 = vector.load %arg4[%c96, %c0_110] : memref<144x16xbf16, #tpu.memory_space<vmem>>, vector<16x16xbf16>
    %cst_111 = arith.constant dense<0.000000e+00> : vector<64x16xf32>
    %200 = tpu.matmul %198, %199, %cst_111 {dimension_numbers = #tpu.dot_dimension_numbers<[1], [0], [0], [1], [0, 0, 1, 1], [], []>} : vector<64x16xbf16>, vector<16x16xbf16>, vector<64x16xf32> -> vector<64x16xf32>
    %201 = arith.addf %197, %200 : vector<64x16xf32>
    %202 = tpu.concatenate %121, %124, %155, %158 in 0 : vector<16x16xbf16>, vector<16x16xbf16>, vector<16x16xbf16>, vector<16x16xbf16> -> vector<64x16xbf16>
    %c112 = arith.constant 112 : index
    %c0_112 = arith.constant 0 : index
    %203 = vector.load %arg4[%c112, %c0_112] : memref<144x16xbf16, #tpu.memory_space<vmem>>, vector<16x16xbf16>
    %cst_113 = arith.constant dense<0.000000e+00> : vector<64x16xf32>
    %204 = tpu.matmul %202, %203, %cst_113 {dimension_numbers = #tpu.dot_dimension_numbers<[1], [0], [0], [1], [0, 0, 1, 1], [], []>} : vector<64x16xbf16>, vector<16x16xbf16>, vector<64x16xf32> -> vector<64x16xf32>
    %205 = arith.addf %201, %204 : vector<64x16xf32>
    %206 = tpu.concatenate %124, %138, %158, %172 in 0 : vector<16x16xbf16>, vector<16x16xbf16>, vector<16x16xbf16>, vector<16x16xbf16> -> vector<64x16xbf16>
    %c128 = arith.constant 128 : index
    %c0_114 = arith.constant 0 : index
    %207 = vector.load %arg4[%c128, %c0_114] : memref<144x16xbf16, #tpu.memory_space<vmem>>, vector<16x16xbf16>
    %cst_115 = arith.constant dense<0.000000e+00> : vector<64x16xf32>
    %208 = tpu.matmul %206, %207, %cst_115 {dimension_numbers = #tpu.dot_dimension_numbers<[1], [0], [0], [1], [0, 0, 1, 1], [], []>} : vector<64x16xbf16>, vector<16x16xbf16>, vector<64x16xf32> -> vector<64x16xf32>
    %209 = arith.addf %205, %208 : vector<64x16xf32>
    %210 = vector.extract_strided_slice %209 {offsets = [0, 0], sizes = [16, 16], strides = [1, 1]} : vector<64x16xf32> to vector<16x16xf32>
    %211 = vector.extract_strided_slice %209 {offsets = [16, 0], sizes = [16, 16], strides = [1, 1]} : vector<64x16xf32> to vector<16x16xf32>
    %212 = arith.maximumf %210, %211 : vector<16x16xf32>
    %213 = vector.extract_strided_slice %209 {offsets = [32, 0], sizes = [16, 16], strides = [1, 1]} : vector<64x16xf32> to vector<16x16xf32>
    %214 = vector.extract_strided_slice %209 {offsets = [48, 0], sizes = [16, 16], strides = [1, 1]} : vector<64x16xf32> to vector<16x16xf32>
    %215 = arith.maximumf %213, %214 : vector<16x16xf32>
    %216 = arith.maximumf %212, %215 : vector<16x16xf32>
    %c0_116 = arith.constant 0 : index
    %c0_117 = arith.constant 0 : index
    %217 = vector.load %arg5[%c0_116, %c0_117] : memref<1x16xf32, #tpu.memory_space<vmem>>, vector<1x16xf32>
    %218 = vector.broadcast %217 : vector<1x16xf32> to vector<16x16xf32>
    %219 = arith.addf %216, %218 : vector<16x16xf32>
    %cst_118 = arith.constant 0.000000e+00 : f32
    %220 = vector.broadcast %cst_118 : f32 to vector<16x16xf32>
    %221 = arith.maximumf %219, %220 : vector<16x16xf32>
    %c0_119 = arith.constant 0 : index
    %c0_120 = arith.constant 0 : index
    %c0_121 = arith.constant 0 : index
    %222 = vector.load %arg6[%c0_119, %c0_120, %c0_121] : memref<1x16x16xf32, #tpu.memory_space<vmem>>, vector<1x16x16xf32>
    %223 = vector.shape_cast %222 : vector<1x16x16xf32> to vector<16x16xf32>
    %224 = vector.shape_cast %221 : vector<16x16xf32> to vector<1x16x16xf32>
    tpu.vector_store %arg6[%c0_119, %c0_120, %c0_121], %224 {strides = array<i32>} : memref<1x16x16xf32, #tpu.memory_space<vmem>>, vector<1x16x16xf32>,
    return
  }
  func.func @transform_0(%arg0: i32) -> (i32, i32, i32) {
    %c0_i32 = arith.constant 0 : i32
    %c0_i32_0 = arith.constant 0 : i32
    %c0_i32_1 = arith.constant 0 : i32
    return %arg0, %c0_i32, %c0_i32_0 : i32, i32, i32
  }
  func.func @transform_1(%arg0: i32) -> (i32, i32) {
    %c0_i32 = arith.constant 0 : i32
    %c0_i32_0 = arith.constant 0 : i32
    %c0_i32_1 = arith.constant 0 : i32
    return %c0_i32, %c0_i32_0 : i32, i32
  }
  func.func @transform_2(%arg0: i32) -> (i32, i32) {
    %c0_i32 = arith.constant 0 : i32
    %c0_i32_0 = arith.constant 0 : i32
    %c0_i32_1 = arith.constant 0 : i32
    return %c0_i32, %c0_i32_0 : i32, i32
  }
  func.func @transform_3(%arg0: i32) -> (i32, i32) {
    %c0_i32 = arith.constant 0 : i32
    %c0_i32_0 = arith.constant 0 : i32
    %c0_i32_1 = arith.constant 0 : i32
    return %c0_i32, %c0_i32_0 : i32, i32
  }
  func.func @transform_4(%arg0: i32) -> (i32, i32) {
    %c0_i32 = arith.constant 0 : i32
    %c0_i32_0 = arith.constant 0 : i32
    %c0_i32_1 = arith.constant 0 : i32
    return %c0_i32, %c0_i32_0 : i32, i32
  }
  func.func @transform_5(%arg0: i32) -> (i32, i32, i32) {
    %c0_i32 = arith.constant 0 : i32
    %c0_i32_0 = arith.constant 0 : i32
    %c0_i32_1 = arith.constant 0 : i32
    return %arg0, %c0_i32, %c0_i32_0 : i32, i32, i32
  }
}

</mosaic_0001>

<bundles_post_ra>
// kernel: cnn_forward.1
= control target key start
LH: loop header
LB: loop body
LE: loop exit
PB: predicated region body
PF: predicated region fallthrough
CT: control target
= control target key end

     0   :  { %10 = vsyncpa [#allocation4], 0  ;;  %s2412_s0 = inlined_call_operand.vmem [shape: bf16[2,256,9], index: 0, kind: input, shape index: {}]   ;;  %s2413_s1 = inlined_call_operand.vmem [shape: bf16[9,16], index: 1, kind: input, shape index: {}]   ;;  %s2414_s2 = inlined_call_operand.vmem [shape: f32[1,16], index: 2, kind: input, shape index: {}]   ;;  %s2415_s3 = inlined_call_operand.vmem [shape: bf16[144,16], index: 3, kind: input, shape index: {}]   ;;  %s2416_s4 = inlined_call_operand.vmem [shape: f32[1,16], index: 4, kind: input, shape index: {}]   ;;  %s2417_s5 = inlined_call_operand.hbm [shape: f32[2,16,16], index: 5, kind: output, shape index: {}]  }
   0x1   :  { %12 = vsyncpa [#allocation4 + $0x1], 0  ;;  %s2090_s18 = smov 0   ;;  %s2092_s19 = smov 0  }
   0x2   :  { %s2094_s20 = smov 0   ;;  %s2096_s21 = smov 0  }
   0x3 LB: > { %s2111_s22 = sadd.s32 4294967295, %s2053_s21   ;;  %s1576_s23 = sadd.s32 4294967294, %s2053_s21   ;;  %s2053_s21 = sphi %s2096_s21, %s2423_s21   ;;  %s2049_s20 = sphi %s2094_s20, %s2422_s20   ;;  %s2045_s19 = sphi %s2092_s19, %s2421_s19   ;;  %s2041_s18 = sphi %s2090_s18, %s2420_s18  }
   0x4   : > { %s2115_s24 = sadd.s32 1, %s2053_s21   ;;  %s135_s25 = sadd.s32 1, %s2049_s20 }
   0x5   : > { %s132_s26 = ssub.s32 %s2053_s21, %s2115_s24  ;;  %p145_p0 = scmp.ne.s32.totalorder %s2049_s20, %s2045_s19 }
   0x6   : > { %p133_p1 = scmp.eq.s32.totalorder %s132_s26, 0  ;;  %p146_p2 = scmp.eq.s32.totalorder %s2111_s22, 1 }
   0x7   : > { %p151_p3 = scmp.ne.s32.totalorder %s2045_s19, %s2041_s18  ;;  %p152_p4 = scmp.eq.s32.totalorder %s1576_s23, 1 }
   0x8   : > { %s2126_s27 = scalar_select %p133_p1, %s2049_s20, %s135_s25  }
   0x9   : > { %p2128_p5 = por %p146_p2, %p145_p0  ;;  %p2132_p6 = por %p152_p4, %p151_p3 }
   0xa   : > { %p1579_p7 = scmp.ge.s32.totalorder %s2053_s21, 1  ;;  %p190_p8 = scmp.lt.s32.totalorder %s2053_s21, 3 }
   0xc   : > { %p191_p9 = pnand %p1579_p7, %p190_p8 }
   0xd   : > { %v1965_v0 = vld [vmem:[%s2413_s1] sm:$0x1f] (!%p191_p9)   ;;  %vm392_vm0 = vcmask (!%p191_p9), 1043456   ;;  %vm393_vm1 = vcmask (!%p191_p9), 1044480   ;;  %p218_p10 = scmp.lt.s32.totalorder (!%p191_p9), %s2111_s22, 1  ;;  %v2055_v1 = vmov (!%p191_p9), 65535   ;;  %v635_v58 = vlaneseq (!%p191_p9) }
   0xe   : > { %194 = sbr.rel (%p191_p9) target bundleno = 646 (0x286), region = 40  ;;  %v394_v2 = vsel (!%p191_p9), %vm392_vm0, 4294967295, %v2055_v1  ;;  %vm343_vm2 = vcmask (!%p191_p9), 72704   ;;  %vm607_vm3 = vcmask (!%p191_p9), 130048   ;;  %v2056_v21 = vmov (!%p191_p9), 0.0   ;;  %v2197_v22 = vld [vmem:[%s2415_s3 + $0x10] sm:$0xff] (!%p191_p9)  }
   0xf   : > { %v395_v3 = vsel (!%p191_p9), %vm393_vm1, %v394_v2, 0  ;;  %613 = vst.msk [vmem:[#allocation2 + $0x28] sm:$0xff] (!%p191_p9), %vm607_vm3, %v2056_v21  ;;  %609 = vst.msk [vmem:[#allocation2 + $0x8] sm:$0xff] (!%p191_p9), %vm607_vm3, %v2056_v21  ;;  %1856 = vmatprep.subr.bf16.mxu1 (!%p191_p9), %v2197_v22  ;;  %v1983_v23 = vld [vmem:[%s2415_s3 + $0x8] sm:$0xff] (!%p191_p9)   ;;  %v2207_v24 = vld [vmem:[%s2415_s3 + $0x18] sm:$0xff] (!%p191_p9)   ;;  %v636_v60 = vshrl.u32 (!%p191_p9), %v635_v58, 7 }
  0x10   : > { %v397_v4 = vand.u32 (!%p191_p9), %v1965_v0, %v395_v3  ;;  %610 = vst.msk [vmem:[#allocation2 + $0x10] sm:$0xff] (!%p191_p9), %vm607_vm3, %v2056_v21  ;;  %611 = vst.msk [vmem:[#allocation2 + $0x18] sm:$0xff] (!%p191_p9), %vm607_vm3, %v2056_v21  ;;  %1857 = vmatpush3.bf16.msra.mxu1 (!%p191_p9), %v2197_v22  ;;  %v2213_v25 = vld [vmem:[%s2415_s3] sm:$0xff] (!%p191_p9)   ;;  %s215_s16 = sand.u32 (!%p191_p9), 1, %s2045_s19   ;;  %s1669_s26 = sshll.u32 (!%p191_p9), %s2111_s22, 8 }
  0x11   : > { %612 = vst.msk [vmem:[#allocation2 + $0x20] sm:$0xff] (!%p191_p9), %vm607_vm3, %v2056_v21  ;;  %614 = vst.msk [vmem:[#allocation2 + $0x30] sm:$0xff] (!%p191_p9), %vm607_vm3, %v2056_v21  ;;  %1796 = vmatprep.subr.bf16.mxu1 (!%p191_p9), %v2207_v24  ;;  %v1616_v63 = vld [vmem:[%s2414_s2] ss:$0 sm:$0xff] (!%p191_p9)  ;;  %s1580_s17 = sshll.u32 (!%p191_p9), %s215_s16, 4  ;;  %s2365_s9 = scalar_lea.hbm (!%p191_p9), %s2417_s5, %s1669_s26 }
  0x12   : > { %1732 = vmatprep.subr.bf16.mxu0 (!%p191_p9), %v397_v4  ;;  %615 = vst.msk [vmem:[#allocation2 + $0x38] sm:$0xff] (!%p191_p9), %vm607_vm3, %v2056_v21  ;;  %616 = vst.msk [vmem:[#allocation2 + $0x40] sm:$0xff] (!%p191_p9), %vm607_vm3, %v2056_v21  ;;  %s217_s30 = scalar_lea.vmem (!%p191_p9), [#allocation3], %s1580_s17 }
  0x13   : > { %1733 = vmatpush3.bf16.msra.mxu0 (!%p191_p9), %v397_v4  ;;  %617 = vst.msk [vmem:[#allocation2 + $0x48] sm:$0xff] (!%p191_p9), %vm607_vm3, %v2056_v21  ;;  %618 = vst.msk [vmem:[#allocation2 + $0x50] sm:$0xff] (!%p191_p9), %vm607_vm3, %v2056_v21  ;;  %s1514_s6 = sshll.u32 (!%p191_p9), %s217_s30, 4  ;;  %s2367_s6 = int_to_ptr.vmem [resolvable:$true] %s1514_s6 }
  0x14   : > { %619 = vst.msk [vmem:[#allocation2 + $0x58] sm:$0xff] (!%p191_p9), %vm607_vm3, %v2056_v21  ;;  %620 = vst.msk [vmem:[#allocation2 + $0x60] sm:$0xff] (!%p191_p9), %vm607_vm3, %v2056_v21  ;;  %1766 = vmatprep.subr.bf16.mxu0 (!%p191_p9), %v1983_v23  ;;  %s1991_s10 = scalar_lea.vmem (!%p191_p9), %s2367_s6, 256 }
  0x15   : > { %s219_s7 = scalar_select %p218_p10, %s2111_s22, 1  ;;  %621 = vst.msk [vmem:[#allocation2 + $0x68] sm:$0xff] %vm607_vm3, %v2056_v21  ;;  %622 = vst.msk [vmem:[#allocation2 + $0x70] sm:$0xff] %vm607_vm3, %v2056_v21 }
  0x16   : > { %s2371_s22 = scalar_lea.sflag [#allocation4], %s215_s16  ;;  %p1992_p11 = scmp.ne.s32.totalorder %s2367_s6, %s1991_s10 }
  0x17   : > { %s1668_s8 = sshll.u32 %s219_s7, 7 }
  0x18   : > { %s2146_s11 = scalar_lea.vmem %s2412_s0, %s1668_s8  ;;  %p1993_p12 = pnand %p1992_p11, %p2128_p5 }
  0x19   : > { %v1966_v5 = vld [vmem:[%s2146_s11] sm:$0xff]   ;;  %v1967_v6 = vld [vmem:[%s2146_s11 + $0x8] sm:$0xff]   ;;  %v1968_v7 = vld [vmem:[%s2146_s11 + $0x10] sm:$0xff]  }
  0x1a   : > { %1734 = vmatprep.mubr.msk.bf16.mxu0 %vm343_vm2, %v1966_v5  ;;  %v1969_v8 = vld [vmem:[%s2146_s11 + $0x18] sm:$0xff]   ;;  %v1970_v9 = vld [vmem:[%s2146_s11 + $0x20] sm:$0xff]   ;;  %v1971_v10 = vld [vmem:[%s2146_s11 + $0x28] sm:$0xff]   ;;  %p1994_p13 = pneg %p1993_p12 }
  0x1b   : > { %1735 = vmatmul.mubr.msk.bf16.vlgmr.msra.gmra.mrb[0].mxu0 %vm343_vm2, %v1967_v6  ;;  %v1972_v11 = vld [vmem:[%s2146_s11 + $0x30] sm:$0xff]   ;;  %v1973_v12 = vld [vmem:[%s2146_s11 + $0x38] sm:$0xff]   ;;  %v1974_v13 = vld [vmem:[%s2146_s11 + $0x40] sm:$0xff]  }
  0x1c   : > { %1738 = vmatprep.mubr.msk.bf16.mxu0 %vm343_vm2, %v1968_v7  ;;  %v1975_v14 = vld [vmem:[%s2146_s11 + $0x48] sm:$0xff]   ;;  %v1976_v15 = vld [vmem:[%s2146_s11 + $0x50] sm:$0xff]   ;;  %v1977_v16 = vld [vmem:[%s2146_s11 + $0x58] sm:$0xff]   ;;  %1767 = vmatpush3.bf16.msra.mxu0 %v1983_v23  ;;  %v637_v7 = vadd.s32 8, %v636_v60 }
  0x1d   : > { %v1978_v17 = vld [vmem:[%s2146_s11 + $0x60] sm:$0xff]   ;;  %v1979_v18 = vld [vmem:[%s2146_s11 + $0x68] sm:$0xff]   ;;  %v1980_v19 = vld [vmem:[%s2146_s11 + $0x70] sm:$0xff]   ;;  %1776 = vmatprep.subr.bf16.mxu0 %v2213_v25 }
  0x1e   : > { %v1981_v20 = vld [vmem:[%s2146_s11 + $0x78] sm:$0xff]   ;;  %s2057_s11 = smov [#allocation3]  }
  0x1f   : > { %s1995_s12 = sshll.u32 %s2057_s11, 4  ;;  %s1996_s12 = int_to_ptr.vmem [resolvable:$false] %s1995_s12 }
  0x20   : > { %s1997_s13 = scalar_lea.vmem %s1996_s12, 512  ;;  %p1998_p0 = scmp.lt.s32.totalorder %s2367_s6, %s1996_s12 }
  0x21   : > { %p1999_p1 = scmp.lt.s32.totalorder %s1997_s13, %s1991_s10 }
  0x23   : > { %1739 = vmatmul.mubr.msk.bf16.gmra.mrb[4].mxu0 %vm343_vm2, %v1969_v8  ;;  %p2000_p2 = por %p1999_p1, %p1998_p0 }
  0x24   : > { %1742 = vmatprep.mubr.msk.bf16.mxu0 %vm343_vm2, %v1970_v9 }
  0x25   : > { %p2001_p3 = pnand %p2000_p2, %p1994_p13 }
  0x2b   : > { %1743 = vmatmul.mubr.msk.bf16.gmra.mrb[8].mxu0 %vm343_vm2, %v1971_v10 }
  0x2c   : > { %1746 = vmatprep.mubr.msk.bf16.mxu0 %vm343_vm2, %v1972_v11 }
  0x33   : > { %1747 = vmatmul.mubr.msk.bf16.gmra.mrb[12].mxu0 %vm343_vm2, %v1973_v12 }
  0x34   : > { %1750 = vmatprep.mubr.msk.bf16.mxu0 %vm343_vm2, %v1974_v13 }
  0x3b   : > { %1751 = vmatmul.mubr.msk.bf16.gmra.mrb[16].mxu0 %vm343_vm2, %v1975_v14 }
  0x3c   : > { %1754 = vmatprep.mubr.msk.bf16.mxu0 %vm343_vm2, %v1976_v15 }
  0x43   : > { %1755 = vmatmul.mubr.msk.bf16.gmra.mrb[20].mxu0 %vm343_vm2, %v1977_v16 }
  0x44   : > { %1758 = vmatprep.mubr.msk.bf16.mxu0 %vm343_vm2, %v1978_v17  ;;  %v639_v17 = vand.u32 3, %v637_v7 }
  0x4b   : > { %1759 = vmatmul.mubr.msk.bf16.gmra.mrb[24].mxu0 %vm343_vm2, %v1979_v18 }
  0x4c   : > { %1762 = vmatprep.mubr.msk.bf16.mxu0 %vm343_vm2, %v1980_v19 }
  0x53   : > { %1763 = vmatmul.mubr.msk.bf16.gmra.mrb[28].mxu0 %vm343_vm2, %v1981_v20 }
  0xee   : > { %v1736_v26 = vpop.f32.mrb[0].mxu0 }
  0xef   : > { %v433_v27 = vpop.f32.mrb[1].mxu0 }
  0xf0   : > { %v1737_v28 = vpop.f32.mrb[2].mxu0 }
  0xf1   : > { %v436_v29 = vpop.f32.mrb[3].mxu0 }
  0xf6   : > { %v2216_v30 = vpop.f32.mrb[4].mxu0 }
  0xf7   : > { %v2218_v31 = vpop.f32.mrb[5].mxu0 }
  0xf8   : > { %v2220_v32 = vpop.f32.mrb[6].mxu0 }
  0xf9   : > { %v2222_v33 = vpop.f32.mrb[7].mxu0 }
  0xfe   : > { %v1744_v34 = vpop.f32.mrb[8].mxu0 }
  0xff   : > { %v562_v35 = vmax.f32 %v1736_v26, %v1744_v34  ;;  %v465_v36 = vpop.f32.mrb[9].mxu0 }
 0x100   : > { %v560_v37 = vmax.f32 %v433_v27, %v465_v36  ;;  %v1745_v38 = vpop.f32.mrb[10].mxu0  ;;  %v638_v27 = vand.u32 3, %v636_v60 }
 0x101   : > { %v563_v39 = vmax.f32 %v1737_v28, %v1745_v38  ;;  %v468_v40 = vpop.f32.mrb[11].mxu0 }
 0x102   : > { %v561_v41 = vmax.f32 %v436_v29, %v468_v40  ;;  %v2237_v36 = vadd.s32 1, %v638_v27  ;;  %v2241_v40 = vadd.s32 4294967295, %v638_v27 }
 0x104   : > { %vm665_vm5 = vcmp.lt.s32.totalorder %v2237_v36, 4  ;;  %vm644_vm7 = vcmp.ge.s32.totalorder %v2241_v40, 0  ;;  %v1990_v36 = vld [vmem:[%s2415_s3 + $0x40] sm:$0xff]  }
 0x106   : > { %v1748_v42 = vpop.f32.mrb[12].mxu0 }
 0x107   : > { %v566_v43 = vmax.f32 %v2216_v30, %v1748_v42  ;;  %v481_v44 = vpop.f32.mrb[13].mxu0 }
 0x108   : > { %v564_v45 = vmax.f32 %v2218_v31, %v481_v44  ;;  %v1749_v46 = vpop.f32.mrb[14].mxu0 }
 0x109   : > { %v567_v47 = vmax.f32 %v2220_v32, %v1749_v46  ;;  %v484_v48 = vpop.f32.mrb[15].mxu0 }
 0x10a   : > { %v565_v49 = vmax.f32 %v2222_v33, %v484_v48  ;;  %v2235_v33 = vadd.s32 4294967295, %v639_v17 }
 0x10c   : > { %vm645_vm4 = vcmp.ge.s32.totalorder %v2235_v33, 0 }
 0x10e   : > { %v1752_v50 = vpop.f32.mrb[16].mxu0 }
 0x10f   : > { %v497_v51 = vpop.f32.mrb[17].mxu0 }
 0x110   : > { %v1753_v52 = vpop.f32.mrb[18].mxu0 }
 0x111   : > { %v500_v53 = vpop.f32.mrb[19].mxu0 }
 0x116   : > { %v1756_v54 = vpop.f32.mrb[20].mxu0 }
 0x117   : > { %v513_v55 = vpop.f32.mrb[21].mxu0 }
 0x118   : > { %v1757_v56 = vpop.f32.mrb[22].mxu0 }
 0x119   : > { %v516_v57 = vpop.f32.mrb[23].mxu0 }
 0x11e   : > { %v1760_v59 = vpop.f32.mrb[24].mxu0 }
 0x11f   : > { %v570_v61 = vmax.f32 %v1752_v50, %v1760_v59  ;;  %v529_v62 = vpop.f32.mrb[25].mxu0  ;;  %v1985_v59 = vld [vmem:[%s2415_s3 + $0x20] sm:$0xff]  }
 0x120   : > { %v568_v0 = vmax.f32 %v497_v51, %v529_v62  ;;  %v1761_v1 = vpop.f32.mrb[26].mxu0 }
 0x121   : > { %v578_v2 = vmax.f32 %v562_v35, %v570_v61  ;;  %v571_v3 = vmax.f32 %v1753_v52, %v1761_v1  ;;  %v532_v4 = vpop.f32.mrb[27].mxu0 }
 0x122   : > { %v576_v5 = vmax.f32 %v560_v37, %v568_v0  ;;  %v569_v6 = vmax.f32 %v500_v53, %v532_v4  ;;  %v2239_v37 = vadd.s32 1, %v639_v17 }
 0x123   : > { %v593_v8 = vadd.f32 %v1616_v63, %v578_v2  ;;  %v579_v9 = vmax.f32 %v563_v39, %v571_v3 }
 0x124   : > { %v591_v10 = vadd.f32 %v1616_v63, %v576_v5  ;;  %v577_v11 = vmax.f32 %v561_v41, %v569_v6  ;;  %vm666_vm6 = vcmp.lt.s32.totalorder %v2239_v37, 4 }
 0x125   : > { %v601_v12 = vmax.f32 %v593_v8, 0.0  ;;  %v594_v13 = vadd.f32 %v1616_v63, %v579_v9 }
 0x126   : > { %v599_v14 = vmax.f32 %v591_v10, 0.0  ;;  %v592_v15 = vadd.f32 %v1616_v63, %v577_v11  ;;  %v1764_v16 = vpop.f32.mrb[28].mxu0 }
 0x127   : > { %627 = vst.msk [vmem:[#allocation2 + $0x28] sm:$0xff] %vm607_vm3, %v601_v12  ;;  %v602_v18 = vmax.f32 %v594_v13, 0.0  ;;  %v574_v19 = vmax.f32 %v1756_v54, %v1764_v16  ;;  %v545_v20 = vpop.f32.mrb[29].mxu0 }
 0x128   : > { %624 = vst.msk [vmem:[#allocation2 + $0x8] sm:$0xff] %vm607_vm3, %v599_v14  ;;  %v600_v21 = vmax.f32 %v592_v15, 0.0  ;;  %v572_v23 = vmax.f32 %v513_v55, %v545_v20  ;;  %v1765_v26 = vpop.f32.mrb[30].mxu0  ;;  %v1987_v14 = vld [vmem:[%s2415_s3 + $0x28] sm:$0xff]  }
 0x129   : > { %628 = vst.msk [vmem:[#allocation2 + $0x30] sm:$0xff] %vm607_vm3, %v602_v18  ;;  %v582_v28 = vmax.f32 %v566_v43, %v574_v19  ;;  %v575_v29 = vmax.f32 %v1757_v56, %v1765_v26  ;;  %v548_v30 = vpop.f32.mrb[31].mxu0 }
 0x12a   : > { %625 = vst.msk [vmem:[#allocation2 + $0x10] sm:$0xff] %vm607_vm3, %v600_v21  ;;  %v580_v31 = vmax.f32 %v564_v45, %v572_v23  ;;  %v573_v32 = vmax.f32 %v516_v57, %v548_v30 }
 0x12b   : > { %v597_v34 = vadd.f32 %v1616_v63, %v582_v28  ;;  %v583_v35 = vmax.f32 %v567_v47, %v575_v29 }
 0x12c   : > { %v595_v38 = vadd.f32 %v1616_v63, %v580_v31  ;;  %v581_v39 = vmax.f32 %v565_v49, %v573_v32 }
 0x12d   : > { %v605_v41 = vmax.f32 %v597_v34, 0.0  ;;  %v598_v42 = vadd.f32 %v1616_v63, %v583_v35  ;;  %v1989_v35 = vld [vmem:[%s2415_s3 + $0x38] sm:$0xff]  }
 0x12e   : > { %v603_v43 = vmax.f32 %v595_v38, 0.0  ;;  %v596_v44 = vadd.f32 %v1616_v63, %v581_v39  ;;  %v680_v46 = vld [vmem:[#allocation2 + $0x28] sm:$0xff] }
 0x12f   : > { %633 = vst.msk [vmem:[#allocation2 + $0x68] sm:$0xff] %vm607_vm3, %v605_v41  ;;  %v606_v45 = vmax.f32 %v598_v42, 0.0  ;;  %v672_v49 = vld [vmem:[#allocation2 + $0x27] sm:$0xff] }
 0x130   : > { %630 = vst.msk [vmem:[#allocation2 + $0x48] sm:$0xff] %vm607_vm3, %v603_v43  ;;  %v604_v47 = vmax.f32 %v596_v44, 0.0  ;;  %v681_v48 = vld [vmem:[#allocation2 + $0x30] sm:$0xff]  ;;  %v674_v58 = vsel %vm644_vm7, %v672_v49, 0.0  ;;  %v677_v10 = vld [vmem:[#allocation2 + $0x8] sm:$0xff] }
 0x131   : > { %v673_v50 = vld [vmem:[#allocation2 + $0x2f] sm:$0xff]  ;;  %634 = vst.msk [vmem:[#allocation2 + $0x70] sm:$0xff] %vm607_vm3, %v606_v45  ;;  %v2250_v51 = vpack.c.bf16 %v681_v48, %v680_v46 }
 0x132   : > { %v683_v52 = vld [vmem:[#allocation2 + $0x9] sm:$0xff]  ;;  %v684_v53 = vld [vmem:[#allocation2 + $0x11] sm:$0xff]  ;;  %v675_v54 = vsel %vm645_vm4, %v673_v50, 0.0  ;;  %631 = vst.msk [vmem:[#allocation2 + $0x50] sm:$0xff] %vm607_vm3, %v604_v47 }
 0x133   : > { %v685_v55 = vsel %vm665_vm5, %v683_v52, 0.0  ;;  %v686_v56 = vsel %vm666_vm6, %v684_v53, 0.0  ;;  %1792 = vmatprep.mubr.msk.bf16.mxu1 %vm607_vm3, %v2250_v51  ;;  %v715_v60 = vld [vmem:[#allocation2 + $0xd] sm:$0xff]  ;;  %v676_v61 = vpack.c.bf16 %v675_v54, %v674_v58  ;;  %v716_v62 = vld [vmem:[#allocation2 + $0x15] sm:$0xff] }
 0x134   : > { %v2261_v57 = vpack.c.bf16 %v686_v56, %v685_v55  ;;  %v2270_v63 = vsel %vm665_vm5, %v715_v60, 0.0  ;;  %v2276_v0 = vsel %vm666_vm6, %v716_v62, 0.0  ;;  %v678_v3 = vld [vmem:[#allocation2 + $0x10] sm:$0xff] }
 0x135   : > { %v719_v1 = vpack.c.bf16 %v2276_v0, %v2270_v63  ;;  %v704_v44 = vld [vmem:[#allocation2 + $0x2b] sm:$0xff]  ;;  %v705_v45 = vld [vmem:[#allocation2 + $0x33] sm:$0xff] }
 0x136   : > { %1793 = vmatmul.mubr.msk.bf16.vlgmr.msra.gmra.mrb[0].mxu1 %vm607_vm3, %v2261_v57  ;;  %v688_v7 = vld [vmem:[#allocation2 + $0x67] sm:$0xff]  ;;  %v706_v46 = vsel %vm644_vm7, %v704_v44, 0.0  ;;  %v707_v47 = vsel %vm645_vm4, %v705_v45, 0.0  ;;  %v710_v49 = vld [vmem:[#allocation2 + $0x14] sm:$0xff] }
 0x137   : > { %1797 = vmatpush3.bf16.msra.mxu1 %v2207_v24  ;;  %1798 = vmatprep.mubr.msk.bf16.mxu1 %vm607_vm3, %v676_v61  ;;  %v653_v5 = vld [vmem:[#allocation2 + $0x44] sm:$0xff]  ;;  %v679_v24 = vpack.c.bf16 %v678_v3, %v677_v10  ;;  %v690_v13 = vsel %vm644_vm7, %v688_v7, 0.0  ;;  %v708_v48 = vpack.c.bf16 %v707_v47, %v706_v46  ;;  %v709_v37 = vld [vmem:[#allocation2 + $0xc] sm:$0xff]  ;;  %v713_v40 = vld [vmem:[#allocation2 + $0x34] sm:$0xff] }
 0x138   : > { %1806 = vmatprep.subr.bf16.mxu1 %v1985_v59  ;;  %v657_v2 = vld [vmem:[#allocation2 + $0x6c] sm:$0xff]  ;;  %v656_v9 = vld [vmem:[#allocation2 + $0x64] sm:$0xff]  ;;  %v711_v50 = vpack.c.bf16 %v710_v49, %v709_v37 }
 0x139   : > { %v689_v4 = vld [vmem:[#allocation2 + $0x6f] sm:$0xff]  ;;  %v658_v12 = vpack.c.bf16 %v657_v2, %v656_v9  ;;  %v640_v18 = vld [vmem:[#allocation2 + $0x63] sm:$0xff] }
 0x13a   : > { %v654_v6 = vld [vmem:[#allocation2 + $0x4c] sm:$0xff]  ;;  %v691_v11 = vsel %vm645_vm4, %v689_v4, 0.0  ;;  %v650_v23 = vsel %vm644_vm7, %v640_v18, 0.0 }
 0x13b   : > { %v655_v8 = vpack.c.bf16 %v654_v6, %v653_v5  ;;  %v692_v15 = vpack.c.bf16 %v691_v11, %v690_v13  ;;  %v641_v16 = vld [vmem:[#allocation2 + $0x6b] sm:$0xff] }
 0x13c   : > { %v694_v17 = vld [vmem:[#allocation2 + $0x50] sm:$0xff]  ;;  %v651_v19 = vsel %vm645_vm4, %v641_v16, 0.0  ;;  %v693_v20 = vld [vmem:[#allocation2 + $0x48] sm:$0xff] }
 0x13d   : > { %1768 = vmatprep.mubr.msk.bf16.mxu0 %vm607_vm3, %v655_v8  ;;  %v695_v21 = vpack.c.bf16 %v694_v17, %v693_v20  ;;  %v652_v26 = vpack.c.bf16 %v651_v19, %v650_v23  ;;  %v697_v27 = vld [vmem:[#allocation2 + $0x70] sm:$0xff]  ;;  %v696_v28 = vld [vmem:[#allocation2 + $0x68] sm:$0xff] }
 0x13e   : > { %1769 = vmatmul.mubr.msk.bf16.vlgmr.msra.gmra.mrb[32].mxu0 %vm607_vm3, %v658_v12  ;;  %1799 = vmatmul.mubr.msk.bf16.vlgmr.msra.gmra.mrb[4].mxu1 %vm607_vm3, %v679_v24  ;;  %v698_v29 = vpack.c.bf16 %v697_v27, %v696_v28  ;;  %v660_v30 = vld [vmem:[#allocation2 + $0x4d] sm:$0xff]  ;;  %v659_v31 = vld [vmem:[#allocation2 + $0x45] sm:$0xff] }
 0x13f   : > { %1807 = vmatpush3.bf16.msra.mxu1 %v1985_v59  ;;  %1772 = vmatprep.mubr.msk.bf16.mxu0 %vm607_vm3, %v679_v24  ;;  %v670_v32 = vsel %vm666_vm6, %v660_v30, 0.0  ;;  %v699_v38 = vld [vmem:[#allocation2 + $0x49] sm:$0xff]  ;;  %v700_v39 = vld [vmem:[#allocation2 + $0x51] sm:$0xff] }
 0x140   : > { %1802 = vmatprep.mubr.msk.bf16.mxu1 %vm607_vm3, %v692_v15  ;;  %1777 = vmatpush3.bf16.msra.mxu0 %v2213_v25  ;;  %v1988_v25 = vld [vmem:[%s2415_s3 + $0x30] sm:$0xff]   ;;  %v701_v41 = vsel %vm665_vm5, %v699_v38, 0.0  ;;  %v702_v42 = vsel %vm666_vm6, %v700_v39, 0.0 }
 0x141   : > { %1816 = vmatprep.subr.bf16.mxu1 %v1987_v14  ;;  %1786 = vmatprep.subr.bf16.mxu0 %v2197_v22  ;;  %v703_v43 = vpack.c.bf16 %v702_v42, %v701_v41  ;;  %v712_v33 = vld [vmem:[#allocation2 + $0x2c] sm:$0xff] }
 0x146   : > { %1773 = vmatmul.mubr.msk.bf16.gmra.mrb[36].mxu0 %vm607_vm3, %v2250_v51  ;;  %1803 = vmatmul.mubr.msk.bf16.gmra.mrb[0].mxu1 %vm607_vm3, %v695_v21 }
 0x147   : > { %1778 = vmatprep.mubr.msk.bf16.mxu0 %vm607_vm3, %v652_v26  ;;  %1808 = vmatprep.mubr.msk.bf16.mxu1 %vm607_vm3, %v679_v24 }
 0x14e   : > { %1779 = vmatmul.mubr.msk.bf16.vlgmr.msra.gmra.mrb[32].mxu0 %vm607_vm3, %v655_v8  ;;  %1809 = vmatmul.mubr.msk.bf16.vlgmr.msra.gmra.mrb[4].mxu1 %vm607_vm3, %v2250_v51 }
 0x14f   : > { %1817 = vmatpush3.bf16.msra.mxu1 %v1987_v14  ;;  %1782 = vmatprep.mubr.msk.bf16.mxu0 %vm607_vm3, %v676_v61  ;;  %v1662_v14 = vld [vmem:[%s2416_s4] ss:$0 sm:$0xff] }
 0x150   : > { %1812 = vmatprep.mubr.msk.bf16.mxu1 %vm607_vm3, %v695_v21  ;;  %1787 = vmatpush3.bf16.msra.mxu0 %v2197_v22  ;;  %v669_v22 = vsel %vm665_vm5, %v659_v31, 0.0 }
 0x151   : > { %1826 = vmatprep.subr.bf16.mxu1 %v1988_v25  ;;  %v671_v34 = vpack.c.bf16 %v670_v32, %v669_v22 }
 0x156   : > { %1783 = vmatmul.mubr.msk.bf16.gmra.mrb[36].mxu0 %vm607_vm3, %v679_v24  ;;  %1813 = vmatmul.mubr.msk.bf16.gmra.mrb[0].mxu1 %vm607_vm3, %v698_v29 }
 0x157   : > { %1788 = vmatprep.mubr.msk.bf16.mxu0 %vm607_vm3, %v658_v12  ;;  %1818 = vmatprep.mubr.msk.bf16.mxu1 %vm607_vm3, %v2250_v51  ;;  %v714_v51 = vpack.c.bf16 %v713_v40, %v712_v33 }
 0x15e   : > { %1789 = vmatmul.mubr.msk.bf16.vlgmr.msra.gmra.mrb[32].mxu0 %vm607_vm3, %v671_v34  ;;  %1819 = vmatmul.mubr.msk.bf16.vlgmr.msra.gmra.mrb[4].mxu1 %vm607_vm3, %v2261_v57 }
 0x15f   : > { %1827 = vmatpush3.bf16.msra.mxu1 %v1988_v25  ;;  %1822 = vmatprep.mubr.msk.bf16.mxu1 %vm607_vm3, %v698_v29 }
 0x160   : > { %1836 = vmatprep.subr.bf16.mxu1 %v1989_v35 }
 0x166   : > { %1823 = vmatmul.mubr.msk.bf16.gmra.mrb[0].mxu1 %vm607_vm3, %v703_v43 }
 0x167   : > { %1828 = vmatprep.mubr.msk.bf16.mxu1 %vm607_vm3, %v692_v15 }
 0x16e   : > { %1829 = vmatmul.mubr.msk.bf16.vlgmr.msra.gmra.mrb[4].mxu1 %vm607_vm3, %v695_v21 }
 0x16f   : > { %1837 = vmatpush3.bf16.msra.mxu1 %v1989_v35  ;;  %1832 = vmatprep.mubr.msk.bf16.mxu1 %vm607_vm3, %v708_v48 }
 0x170   : > { %1846 = vmatprep.subr.bf16.mxu1 %v1990_v36 }
 0x176   : > { %1833 = vmatmul.mubr.msk.bf16.gmra.mrb[0].mxu1 %vm607_vm3, %v711_v50 }
 0x177   : > { %1838 = vmatprep.mubr.msk.bf16.mxu1 %vm607_vm3, %v695_v21 }
 0x17e   : > { %1839 = vmatmul.mubr.msk.bf16.vlgmr.msra.gmra.mrb[4].mxu1 %vm607_vm3, %v698_v29 }
 0x17f   : > { %1847 = vmatpush3.bf16.msra.mxu1 %v1990_v36  ;;  %1842 = vmatprep.mubr.msk.bf16.mxu1 %vm607_vm3, %v711_v50 }
 0x186   : > { %1843 = vmatmul.mubr.msk.bf16.gmra.mrb[0].mxu1 %vm607_vm3, %v714_v51 }
 0x187   : > { %1848 = vmatprep.mubr.msk.bf16.mxu1 %vm607_vm3, %v698_v29 }
 0x18e   : > { %1849 = vmatmul.mubr.msk.bf16.vlgmr.msra.gmra.mrb[4].mxu1 %vm607_vm3, %v703_v43 }
 0x18f   : > { %1852 = vmatprep.mubr.msk.bf16.mxu1 %vm607_vm3, %v714_v51 }
 0x196   : > { %1853 = vmatmul.mubr.msk.bf16.gmra.mrb[0].mxu1 %vm607_vm3, %v719_v1 }
 0x229   : > { %v1784_v52 = vpop.f32.mrb[36].mxu0 }
 0x22a   : > { %v869_v53 = vpop.f32.mrb[37].mxu0 }
 0x22b   : > { %v1785_v54 = vpop.f32.mrb[38].mxu0 }
 0x22c   : > { %v872_v55 = vpop.f32.mrb[39].mxu0 }
 0x231   : > { %v1790_v56 = vpop.f32.mrb[32].mxu0 }
 0x232   : > { %v932_v57 = vpop.f32.mrb[33].mxu0 }
 0x233   : > { %v1791_v58 = vpop.f32.mrb[34].mxu0 }
 0x234   : > { %v935_v59 = vpop.f32.mrb[35].mxu0 }
 0x261   : > { %v1850_v60 = vpop.f32.mrb[4].mxu1 }
 0x262   : > { %v1858_v61 = vadd.f32 %v1850_v60, %v1790_v56  ;;  %v1442_v62 = vpop.f32.mrb[5].mxu1 }
 0x263   : > { %v1859_v2 = vadd.f32 %v1442_v62, %v932_v57  ;;  %v1851_v3 = vpop.f32.mrb[6].mxu1 }
 0x264   : > { %v1860_v4 = vadd.f32 %v1851_v3, %v1791_v58  ;;  %v1445_v5 = vpop.f32.mrb[7].mxu1 }
 0x265   : > { %v1481_v6 = vmax.f32 %v1859_v2, %v1858_v61  ;;  %v1861_v63 = vadd.f32 %v1445_v5, %v935_v59 }
 0x267   : > { %v1482_v0 = vmax.f32 %v1861_v63, %v1860_v4 }
 0x269   : > { %v1854_v1 = vpop.f32.mrb[0].mxu1 }
 0x26a   : > { %v1862_v7 = vadd.f32 %v1854_v1, %v1784_v52  ;;  %v1458_v8 = vpop.f32.mrb[1].mxu1 }
 0x26b   : > { %v1863_v9 = vadd.f32 %v1458_v8, %v869_v53  ;;  %v1855_v10 = vpop.f32.mrb[2].mxu1 }
 0x26c   : > { %v1864_v11 = vadd.f32 %v1855_v10, %v1785_v54  ;;  %v1461_v12 = vpop.f32.mrb[3].mxu1 }
 0x26d   : > { %v1483_v24 = vmax.f32 %v1863_v9, %v1862_v7  ;;  %v1865_v13 = vadd.f32 %v1461_v12, %v872_v55 }
 0x26f   : > { %v1485_v15 = vmax.f32 %v1481_v6, %v1483_v24  ;;  %v1484_v16 = vmax.f32 %v1865_v13, %v1864_v11 }
 0x271   : > { %v1494_v17 = vadd.f32 %v1662_v14, %v1485_v15  ;;  %v1486_v18 = vmax.f32 %v1482_v0, %v1484_v16 }
 0x273   : > { %v1496_v19 = vmax.f32 %v1494_v17, 0.0  ;;  %v1495_v20 = vadd.f32 %v1662_v14, %v1486_v18 }
 0x275   : > { %1498 = vst.msk [vmem:[%s217_s30] sm:$0xff] %vm607_vm3, %v1496_v19  ;;  %v1497_v21 = vmax.f32 %v1495_v20, 0.0 }
 0x277   : > { %1499 = vst.msk [vmem:[%s217_s30 + $0x8] sm:$0xff] %vm607_vm3, %v1497_v21 }
 0x278   : > { %2004 = shalt.err (!%p2001_p3)
}
 0x279   : > { %s2005_s14 = scalar_lea.hbm %s2365_s9, 256  ;;  %s2009_s17 = scalar_lea.hbm %s2417_s5, 512 }
 0x27a   : > { %p2006_p4 = scmp.ne.s32.totalorder %s2365_s9, %s2005_s14  ;;  %p2010_p9 = scmp.lt.u32.totalorder %s2365_s9, %s2417_s5 }
 0x27b   : > { %p2011_p10 = scmp.lt.u32.totalorder %s2009_s17, %s2005_s14  ;;  %p2013_p12 = scmp.lt.u32.totalorder %s2005_s14, %s2365_s9 }
 0x27c   : > { %p2007_p7 = pnand %p2006_p4, %p2128_p5 }
 0x27d   : > { %p2012_p11 = por %p2011_p10, %p2010_p9 }
 0x27e   : > { %p2008_p8 = pneg %p2007_p7 }
 0x27f   : > { %p2014_p13 = por %p2013_p12, %p2012_p11 }
 0x281   : > { %p2015_p0 = pnand %p2014_p13, %p2008_p8 }
 0x283   : > { %2018 = shalt.err (!%p2015_p0)
}
 0x284   : > { %s2058_s26 = smov 128   ;;  %s2059_s30 = smov 8  }
 0x285   : > { %1922 = dma.vmem_to_hbm [thread:$0]  (%p2128_p5), %s2367_s6, 256, %s2365_s9, %s2371_s22, %s2058_s26, %s2058_s26, %s2059_s30  }
 0x286 PF: > { %p1928_p1 = scmp.ge.s32.totalorder %s2053_s21, 2  ;;  %s1529_s7 = sand.u32 1, %s2041_s18  }
 0x287   : > { %s1530_s8 = scalar_lea.sflag [#allocation4], %s1529_s7 }
 0x288   : > { %p1925_p2 = pnand %p1928_p1, %p2132_p6 }
 0x28a   : > { %2036 = dma.done.wait (!%p1925_p2), %s1530_s8, 256  }
 0x28b   : > { %2038 = vsyncadd (!%p1925_p2), %s1530_s8, 4294967040  ;;  %p15_p3 = scmp.ge.s32.totalorder %s2115_s24, 4   ;;  %s2420_s18 = smov %s2045_s19 }
 0x28c   : > { %s2421_s19 = smov %s2049_s20  ;;  %s2422_s20 = smov %s2126_s27 }
 0x28d   : > { %s2423_s21 = smov %s2115_s24  ;;  %17 = sbr.rel (!%p15_p3) target bundleno = 3 (0x3), region = 78 }
 0x294   :  { %1535 = vsyncpa [#allocation4], 1 }
 0x295   :  { %1537 = vsyncpa [#allocation4 + $0x1], 1 }

</bundles_post_ra>
